<compile_context>
chip_gen: v5e
topology: v5e:2x2
jax: 0.10.0
libtpu: 0.0.40
codegen_flags: <defaults>
</compile_context>

<pallas_src>
import functools

import jax
import jax.numpy as jnp
from jax import lax
from jax.experimental import pallas as pl
from jax.experimental.pallas import tpu as pltpu


def _round_up(a, b):
    return (a + b - 1) // b * b


def _device_kind():
    try:
        return jax.devices()[0].device_kind.lower()
    except Exception:
        return ""


def _generation_defaults():
    """Returns (target_block_bytes_per_input, num_shards) for the local TPU."""
    kind = _device_kind()
    if "v7" in kind or "7x" in kind:
        return 4 << 20, 2          # v7x: ~3.2 TB/s HBM per TC, 2 TensorCores
    if "v6" in kind:
        return 4 << 20, 1          # v6e: 1 TC, 32 MiB scoped-VMEM default
    if "v5" in kind:
        return 2 << 20, 1          # v5e: 1 TC, 16 MiB scoped-VMEM default
    return 2 << 20, 1              # unknown generation: conservative


def _choose_lane(total):
    """Widest lane count such that total is a multiple of 8*lane (no copy)."""
    for lane in (512, 256, 128):
        if total % (8 * lane) == 0:
            return lane, 0
    lane = 128
    padded = _round_up(total, 8 * lane)
    return lane, padded - total    # rare fallback: small zero-pad required


def _largest_block_rows(shard_rows, target_rows):
    """Largest multiple-of-8 divisor of shard_rows that is <= target_rows."""
    q = shard_rows // 8
    hi = min(q, max(1, target_rows // 8))
    best = 1
    for cand in range(hi, 0, -1):
        if q % cand == 0:
            best = cand
            break
    return 8 * best


def _content_loss_kernel(x_ref, t_ref, o_ref, *, lane, block_rows, unroll):
    """Accumulates sum((x - t)^2) lane/sublane-wise into the resident o block."""
    i = pl.program_id(1)   # reduction ("arbitrary") axis within this shard

    # The output block index depends only on the shard axis, so it stays
    # resident across the reduction axis: zero it once per shard, accumulate
    # every step, and Pallas writes it back when the shard finishes.
    @pl.when(i == 0)
    def _():
        o_ref[...] = jnp.zeros_like(o_ref)

    def body(r, acc):
        s = pl.multiple_of(r * 8, 8)
        xs = x_ref[pl.ds(s, 8), :].astype(jnp.float32)
        ts = t_ref[pl.ds(s, 8), :].astype(jnp.float32)
        d = xs - ts
        return acc + d * d            # VPU only; no cross-lane work here

    acc = lax.fori_loop(0, block_rows // 8, body,
                        jnp.zeros((8, lane), jnp.float32), unroll=unroll)
    o_ref[...] += acc


class ContentLoss:
    """Pallas-TPU port of the tutorial's ContentLoss module.

    __call__(x) stores self.loss = mean((x - target)**2) and returns x
    unchanged (identity passthrough), exactly like the PyTorch module.
    """

    def __init__(self, target):
        self._shape = target.shape
        total = int(target.size)
        self._total = total

        block_bytes, num_shards = _generation_defaults()

        lane, pad = _choose_lane(total)
        rows = (total + pad) // lane                    # multiple of 8

        # Shard across TensorCores only where it helps (v7x) and divides evenly.
        if num_shards > 1 and rows % (8 * num_shards) != 0:
            num_shards = 1

        target_rows = max(8, (block_bytes // (4 * lane)) // 8 * 8)
        shard_rows = rows // num_shards
        block_rows = _largest_block_rows(shard_rows, target_rows)
        if block_rows < 64 and block_rows < shard_rows:
            # Awkward size: exact-fit blocks would be tiny (per-step overhead
            # dominated).  Pad the rows instead — costs one copy of x per
            # forward; target is padded once right here.
            block_rows = min(target_rows, shard_rows)
            rows = _round_up(rows, num_shards * block_rows)
            shard_rows = rows // num_shards
            pad = rows * lane - total
        steps = shard_rows // block_rows

        # Target is fixed in ContentLoss: pad/reshape it ONCE at init.  Zero
        # padding in both operands contributes 0 to the sum of squares.
        tf = target.reshape(-1)
        if pad:
            tf = jnp.pad(tf, (0, pad))
        target2d = tf.reshape(rows, lane)
        self._target2d = target2d

        # ---- Build the pallas_call once. ----
        unroll = max(1, min(4, block_rows // 8))
        kernel = functools.partial(_content_loss_kernel, lane=lane,
                                   block_rows=block_rows, unroll=unroll)
        blk_bytes = block_rows * lane * 4
        kernel_call = pl.pallas_call(
            kernel,
            out_shape=jax.ShapeDtypeStruct((num_shards * 8, lane), jnp.float32),
            grid_spec=pltpu.PrefetchScalarGridSpec(
                num_scalar_prefetch=0,
                grid=(num_shards, steps),
                in_specs=[
                    pl.BlockSpec((block_rows, lane),
                                 lambda p, i: (p * steps + i, 0)),
                    pl.BlockSpec((block_rows, lane),
                                 lambda p, i: (p * steps + i, 0)),
                ],
                out_specs=pl.BlockSpec((8, lane), lambda p, i: (p, 0)),
            ),
            compiler_params=pltpu.CompilerParams(
                # Shard axis parallel (v7x megacore can split it); the
                # reduction axis carries the resident output accumulator.
                dimension_semantics=("parallel", "arbitrary"),
                # 2 inputs x 2 pipeline buffers x block, plus headroom.
                vmem_limit_bytes=4 * blk_bytes + (4 << 20),
            ),
            cost_estimate=pl.CostEstimate(
                flops=3 * total, transcendentals=0, bytes_accessed=8 * total),
        )

        def loss_fn(x, t2d):
            xf = x.reshape(-1)
            if pad:
                xf = jnp.pad(xf, (0, pad))   # rare fallback path only
            x2 = xf.reshape(rows, lane)      # free bitcast when pad == 0
            partials = kernel_call(x2, t2d)
            return jnp.sum(partials) / jnp.float32(total)

        self._loss_fn = jax.jit(loss_fn)
        self.loss = None

    def forward(self, x):
        assert x.shape == self._shape, (x.shape, self._shape)
        self.loss = self._loss_fn(x, self._target2d)
        return x   # identity passthrough: the activation is never rewritten

    __call__ = forward


if __name__ == "__main__":
    key = jax.random.PRNGKey(0)
    k1, k2 = jax.random.split(key)

    # Small NCHW conv-feature-map shapes, consistent with the tutorial.
    x = jax.random.normal(k1, (2, 4, 16, 16), dtype=jnp.float32)
    target = jax.random.normal(k2, (2, 4, 16, 16), dtype=jnp.float32)  # .detach()

    content = ContentLoss(target)
    out = content(x)
    jax.block_until_ready((out, content.loss))

    ref_loss = jnp.mean((x - target) ** 2)
    assert jnp.allclose(content.loss, ref_loss, rtol=1e-5, atol=1e-6), (
        content.loss, ref_loss)
    assert jnp.array_equal(out, x)

    # Ragged element count (exercises the padding fallback path).
    k3, k4 = jax.random.split(k2)
    xr = jax.random.normal(k3, (3, 5, 7, 11), dtype=jnp.float32)
    tr = jax.random.normal(k4, (3, 5, 7, 11), dtype=jnp.float32)
    content_r = ContentLoss(tr)
    out_r = content_r(xr)
    jax.block_until_ready((out_r, content_r.loss))
    ref_r = jnp.mean((xr - tr) ** 2)
    assert jnp.allclose(content_r.loss, ref_r, rtol=1e-5, atol=1e-6), (
        content_r.loss, ref_r)

    print("KERNEL_OK")
</pallas_src>

<mosaic_0001>
module attributes {stable_mosaic.version = 11 : i64} {
  func.func @_content_loss_kernel(%arg0: i32, %arg1: i32, %arg2: memref<8x256xf32, #tpu.memory_space<vmem>>, %arg3: memref<8x256xf32, #tpu.memory_space<vmem>>, %arg4: memref<8x256xf32, #tpu.memory_space<vmem>>) attributes {dimension_semantics = [#tpu.dimension_semantics<parallel>, #tpu.dimension_semantics<arbitrary>], iteration_bounds = array<i64: 1, 1>, scalar_prefetch = 0 : i64, scratch_operands = 0 : i64, tpu.core_type = #tpu.core_type<tc>, window_params = [{transform_indices = @transform_0, window_bounds = array<i64: 8, 256>}, {transform_indices = @transform_1, window_bounds = array<i64: 8, 256>}, {transform_indices = @transform_2, window_bounds = array<i64: 8, 256>}]} {
    %c0_i32 = arith.constant 0 : i32
    %0 = arith.cmpi eq, %arg1, %c0_i32 : i32
    %1 = arith.extui %0 : i1 to i32
    %c0_i32_0 = arith.constant 0 : i32
    %2 = arith.cmpi ne, %1, %c0_i32_0 : i32
    scf.if %2 {
      %cst_7 = arith.constant 0.000000e+00 : f32
      %16 = vector.broadcast %cst_7 : f32 to vector<8x256xf32>
      %c0_8 = arith.constant 0 : index
      %c0_9 = arith.constant 0 : index
      %17 = vector.load %arg4[%c0_8, %c0_9] : memref<8x256xf32, #tpu.memory_space<vmem>>, vector<8x256xf32>
      tpu.vector_store %arg4[%c0_8, %c0_9], %16 {strides = array<i32>} : memref<8x256xf32, #tpu.memory_space<vmem>>, vector<8x256xf32>,
    } else {
    }
    %cst = arith.constant 0.000000e+00 : f32
    %3 = vector.broadcast %cst : f32 to vector<8x256xf32>
    %c0_i32_1 = arith.constant 0 : i32
    %c8_i32 = arith.constant 8 : i32
    %4 = arith.muli %c0_i32_1, %c8_i32 : i32
    %5 = tpu.assume_multiple %4, 8 : i32
    %6 = arith.index_cast %5 : i32 to index
    %c0 = arith.constant 0 : index
    %7 = vector.load %arg2[%6, %c0] : memref<8x256xf32, #tpu.memory_space<vmem>>, vector<8x256xf32>
    %8 = arith.index_cast %5 : i32 to index
    %c0_2 = arith.constant 0 : index
    %9 = vector.load %arg3[%8, %c0_2] : memref<8x256xf32, #tpu.memory_space<vmem>>, vector<8x256xf32>
    %10 = arith.subf %7, %9 : vector<8x256xf32>
    %11 = arith.mulf %10, %10 : vector<8x256xf32>
    %12 = arith.addf %3, %11 : vector<8x256xf32>
    %c1_i32 = arith.constant 1 : i32
    %c0_3 = arith.constant 0 : index
    %c0_4 = arith.constant 0 : index
    %13 = vector.load %arg4[%c0_3, %c0_4] : memref<8x256xf32, #tpu.memory_space<vmem>>, vector<8x256xf32>
    %14 = arith.addf %13, %12 : vector<8x256xf32>
    %c0_5 = arith.constant 0 : index
    %c0_6 = arith.constant 0 : index
    %15 = vector.load %arg4[%c0_5, %c0_6] : memref<8x256xf32, #tpu.memory_space<vmem>>, vector<8x256xf32>
    tpu.vector_store %arg4[%c0_5, %c0_6], %14 {strides = array<i32>} : memref<8x256xf32, #tpu.memory_space<vmem>>, vector<8x256xf32>,
    return
  }
  func.func @transform_0(%arg0: i32, %arg1: i32) -> (i32, i32) {
    %c1_i32 = arith.constant 1 : i32
    %0 = arith.muli %arg0, %c1_i32 : i32
    %1 = arith.addi %0, %arg1 : i32
    %c0_i32 = arith.constant 0 : i32
    %c0_i32_0 = arith.constant 0 : i32
    return %1, %c0_i32 : i32, i32
  }
  func.func @transform_1(%arg0: i32, %arg1: i32) -> (i32, i32) {
    %c1_i32 = arith.constant 1 : i32
    %0 = arith.muli %arg0, %c1_i32 : i32
    %1 = arith.addi %0, %arg1 : i32
    %c0_i32 = arith.constant 0 : i32
    %c0_i32_0 = arith.constant 0 : i32
    return %1, %c0_i32 : i32, i32
  }
  func.func @transform_2(%arg0: i32, %arg1: i32) -> (i32, i32) {
    %c0_i32 = arith.constant 0 : i32
    %c0_i32_0 = arith.constant 0 : i32
    return %arg0, %c0_i32 : i32, i32
  }
}

</mosaic_0001>

<bundles_post_ra>
// kernel: loss_fn.1
= control target key start
LH: loop header
LB: loop body
LE: loop exit
PB: predicated region body
PF: predicated region fallthrough
CT: control target
= control target key end

     0   :  { %s128_s0 = inlined_call_operand.vmem [shape: f32[8,256], index: 0, kind: input, shape index: {}]   ;;  %s129_s1 = inlined_call_operand.vmem [shape: f32[8,256], index: 1, kind: input, shape index: {}]   ;;  %s130_s2 = inlined_call_operand.vmem [shape: f32[8,256], index: 2, kind: output, shape index: {}]  }
   0x1   :  { %v60_v0 = vld [vmem:[%s128_s0] sm:$0xff]  ;;  %v61_v2 = vld [vmem:[%s128_s0 + $0x8] sm:$0xff] }
   0x2   :  { %v64_v1 = vld [vmem:[%s129_s1] sm:$0xff]  ;;  %v65_v4 = vld [vmem:[%s129_s1 + $0x8] sm:$0xff] }
   0x3   :  { %v66_v3 = vsub.f32 %v60_v0, %v64_v1  ;;  %v67_v5 = vsub.f32 %v61_v2, %v65_v4 }
   0x5   :  { %v68_v6 = vmul.f32 %v66_v3, %v66_v3  ;;  %v69_v7 = vmul.f32 %v67_v5, %v67_v5 }
   0x7   :  { %76 = vst [vmem:[%s130_s2] sm:$0xff] %v68_v6 }
   0x8   :  { %77 = vst [vmem:[%s130_s2 + $0x8] sm:$0xff] %v69_v7 }

</bundles_post_ra>
